<compile_context>
chip_gen: v7x
topology: tpu7x:2x2x1
jax: 0.10.0
libtpu: 0.0.40
codegen_flags: <defaults>
</compile_context>

<pallas_src>
import jax
import jax.numpy as jnp
from jax.experimental import pallas as pl
from jax.experimental.pallas import tpu as pltpu

HIDDEN = 32   # hidden_size
VOCAB = 16    # output_size


def decoder_kernel(tok_ref,                 # scalar prefetch (SMEM): (T,) int32 tokens
                   h0_ref,                  # (1, H)   initial hidden state
                   gi_tab_ref,              # (V, 3H)  relu(E) @ W_ih^T + b_ih  [ir|iz|in]
                   wh_ref,                  # (H, 3H)  fused W_hh^T             [hr|hz|hn]
                   bh_ref,                  # (1, 3H)  fused b_hh
                   wout_ref,                # (H, V)   W_out^T
                   bout_ref,                # (1, V)   b_out
                   logp_ref,                # out: (1, 1, V) log-probs for step t
                   hfin_ref,                # out: (1, H) final hidden state
                   h_carry):                # scratch VMEM (1, H): hidden carried over t
    t = pl.program_id(0)
    last = pl.num_programs(0) - 1
    V = gi_tab_ref.shape[0]
    H = wh_ref.shape[0]

    @pl.when(t == 0)
    def _init():
        h_carry[...] = h0_ref[...]

    h = h_carry[...]

    # ---- input gates: bounds-safe lane one-hot gather from the fused table --
    # gi = (relu(E) @ W_ih^T + b_ih)[tok]   via   (1,V) one-hot @ (V,3H) on MXU.
    tok = tok_ref[t]
    col_ids = jax.lax.broadcasted_iota(jnp.int32, (1, V), 1)
    onehot = jnp.where(col_ids == tok, 1.0, 0.0)                 # OOB token -> zeros
    gi = jnp.dot(onehot, gi_tab_ref[...], preferred_element_type=jnp.float32)  # (1, 3H)

    # ---- hidden gates: one fused matmul ------------------------------------
    gh = jnp.dot(h, wh_ref[...], preferred_element_type=jnp.float32) + bh_ref[...]

    # ---- GRU cell (gates via static lane slices) ----------------------------
    #   r = sigmoid(gi_r + gh_r); z = sigmoid(gi_z + gh_z)
    #   n = tanh(gi_n + r * gh_n); h' = (1 - z) * n + z * h
    r = jax.nn.sigmoid(gi[:, 0:H] + gh[:, 0:H])
    z = jax.nn.sigmoid(gi[:, H:2 * H] + gh[:, H:2 * H])
    n = jnp.tanh(gi[:, 2 * H:3 * H] + r * gh[:, 2 * H:3 * H])
    h_new = (1.0 - z) * n + z * h
    h_carry[...] = h_new

    # ---- output projection + log_softmax over vocab (lane axis) -------------
    logits = (jnp.dot(h_new, wout_ref[...], preferred_element_type=jnp.float32)
              + bout_ref[...])
    m = jnp.max(logits, axis=-1, keepdims=True)
    lse = jnp.log(jnp.sum(jnp.exp(logits - m), axis=-1, keepdims=True))
    logp_ref[...] = (logits - m - lse)[None]                     # (1, 1, V)

    @pl.when(t == last)
    def _finalize():
        hfin_ref[...] = h_new


def init_params(key, hidden=HIDDEN, vocab=VOCAB):
    ks = jax.random.split(key, 7)
    scale = 1.0 / jnp.sqrt(hidden)
    return {
        "embedding": jax.random.normal(ks[0], (vocab, hidden), jnp.float32),
        "w_ih": jax.random.uniform(ks[1], (3 * hidden, hidden), jnp.float32, -scale, scale),
        "w_hh": jax.random.uniform(ks[2], (3 * hidden, hidden), jnp.float32, -scale, scale),
        "b_ih": jax.random.uniform(ks[3], (3 * hidden,), jnp.float32, -scale, scale),
        "b_hh": jax.random.uniform(ks[4], (3 * hidden,), jnp.float32, -scale, scale),
        "w_out": jax.random.uniform(ks[5], (vocab, hidden), jnp.float32, -scale, scale),
        "b_out": jax.random.uniform(ks[6], (vocab,), jnp.float32, -scale, scale),
    }


def prepare_weights(params):
    """One-time fuse/transpose, hoisted out of the decode loop.

    Fuses embedding -> relu -> input projection into a single (V, 3H) table.
    """
    emb_relu = jnp.maximum(params["embedding"].astype(jnp.float32), 0.0)      # (V, H)
    gi_tab = emb_relu @ params["w_ih"].T.astype(jnp.float32)                  # (V, 3H)
    gi_tab = gi_tab + params["b_ih"].reshape(1, -1).astype(jnp.float32)
    return {
        "gi_tab": gi_tab,                                                     # (V, 3H)
        "wh_t": params["w_hh"].T.astype(jnp.float32),                         # (H, 3H)
        "bh": params["b_hh"].reshape(1, -1).astype(jnp.float32),              # (1, 3H)
        "wout_t": params["w_out"].T.astype(jnp.float32),                      # (H, V)
        "bout": params["b_out"].reshape(1, -1).astype(jnp.float32),           # (1, V)
    }


def decoder_rnn_decode(prep, tokens, hidden):
    """Teacher-forced multi-step decode in ONE pallas_call.

    tokens: (T,) int32; hidden: (1, 1, H).
    Returns (log_probs (T, V), final hidden (1, 1, H)).
    """
    V, H3 = prep["gi_tab"].shape
    H = prep["wh_t"].shape[0]
    T = tokens.shape[0]
    h2d = hidden.reshape(1, H).astype(jnp.float32)

    def resident(shape):
        # constant index_map -> block stays resident in VMEM across the T grid
        return pl.BlockSpec(shape, lambda t, tok: (0, 0))

    grid_spec = pltpu.PrefetchScalarGridSpec(
        num_scalar_prefetch=1,          # tokens land in SMEM, read per step in-kernel
        grid=(T,),
        in_specs=[
            resident((1, H)),           # initial hidden
            resident((V, H3)),          # fused gi table
            resident((H, H3)),          # W_hh^T fused
            resident((1, H3)),          # b_hh fused
            resident((H, V)),           # W_out^T
            resident((1, V)),           # b_out
        ],
        out_specs=[
            pl.BlockSpec((1, 1, V), lambda t, tok: (t, 0, 0)),   # per-step log-probs
            pl.BlockSpec((1, H), lambda t, tok: (0, 0)),         # final hidden
        ],
        scratch_shapes=[pltpu.VMEM((1, H), jnp.float32)],        # hidden carry
    )

    logp3, h_fin = pl.pallas_call(
        decoder_kernel,
        grid_spec=grid_spec,
        out_shape=(jax.ShapeDtypeStruct((T, 1, V), jnp.float32),
                   jax.ShapeDtypeStruct((1, H), jnp.float32)),
        compiler_params=pltpu.CompilerParams(dimension_semantics=("arbitrary",)),
    )(tokens.astype(jnp.int32), h2d, prep["gi_tab"],
      prep["wh_t"], prep["bh"], prep["wout_t"], prep["bout"])

    return logp3.reshape(T, V), h_fin.reshape(1, 1, H)


def decoder_rnn_forward(params_or_prep, token, hidden):
    """Single-step forward, matching PyTorch DecoderRNN.forward:
    token: int32 (1,); hidden: (1, 1, H) -> ((1, V) log-probs, (1, 1, H))."""
    prep = (params_or_prep if "gi_tab" in params_or_prep
            else prepare_weights(params_or_prep))
    logp, h_new = decoder_rnn_decode(prep, token.reshape(1).astype(jnp.int32), hidden)
    return logp.reshape(1, -1), h_new


def reference_decode(params, tokens, hidden):
    """Pure-JAX reference mirroring the PyTorch forward, stepped over tokens."""
    H = params["w_ih"].shape[1]
    h = hidden.reshape(1, H)
    logps = []
    for tk in tokens:
        x = jnp.maximum(params["embedding"][tk].reshape(1, H), 0.0)
        gi = x @ params["w_ih"].T + params["b_ih"]
        gh = h @ params["w_hh"].T + params["b_hh"]
        r = jax.nn.sigmoid(gi[:, :H] + gh[:, :H])
        z = jax.nn.sigmoid(gi[:, H:2 * H] + gh[:, H:2 * H])
        n = jnp.tanh(gi[:, 2 * H:] + r * gh[:, 2 * H:])
        h = (1.0 - z) * n + z * h
        logits = h @ params["w_out"].T + params["b_out"]
        logps.append(jax.nn.log_softmax(logits, axis=1))
    return jnp.concatenate(logps, axis=0), h.reshape(1, 1, H)


if __name__ == "__main__":
    key = jax.random.PRNGKey(0)
    params = init_params(key)
    prep = prepare_weights(params)                    # hoisted out of the decode loop
    hidden0 = jnp.zeros((1, 1, HIDDEN), jnp.float32)  # DecoderRNN.initHidden()

    # --- single-step forward (exact PyTorch DecoderRNN.forward semantics) ---
    token = jnp.array([3], dtype=jnp.int32)
    log_probs, h1 = decoder_rnn_forward(prep, token, hidden0)
    jax.block_until_ready((log_probs, h1))
    ref_lp, ref_h1 = reference_decode(params, token, hidden0)
    assert log_probs.shape == (1, VOCAB) and h1.shape == (1, 1, HIDDEN)
    assert jnp.allclose(log_probs, ref_lp, atol=1e-4), "single-step log-prob mismatch"
    assert jnp.allclose(h1, ref_h1, atol=1e-4), "single-step hidden mismatch"

    # --- multi-step decode: T steps inside ONE kernel, weights stay resident ---
    T = 8
    tokens = jax.random.randint(jax.random.PRNGKey(1), (T,), 0, VOCAB, dtype=jnp.int32)
    seq_lp, h_fin = decoder_rnn_decode(prep, tokens, hidden0)
    jax.block_until_ready((seq_lp, h_fin))
    ref_seq_lp, ref_hf = reference_decode(params, tokens, hidden0)
    assert seq_lp.shape == (T, VOCAB) and h_fin.shape == (1, 1, HIDDEN)
    assert jnp.allclose(seq_lp, ref_seq_lp, atol=1e-4), "sequence log-prob mismatch"
    assert jnp.allclose(h_fin, ref_hf, atol=1e-4), "sequence hidden mismatch"

    print("KERNEL_OK")
</pallas_src>

<mosaic_0001>
module attributes {stable_mosaic.version = 11 : i64} {
  func.func @decoder_kernel(%arg0: i32, %arg1: memref<1xi32, #tpu.memory_space<smem>>, %arg2: memref<1x32xf32, #tpu.memory_space<vmem>>, %arg3: memref<16x96xf32, #tpu.memory_space<vmem>>, %arg4: memref<32x96xf32, #tpu.memory_space<vmem>>, %arg5: memref<1x96xf32, #tpu.memory_space<vmem>>, %arg6: memref<32x16xf32, #tpu.memory_space<vmem>>, %arg7: memref<1x16xf32, #tpu.memory_space<vmem>>, %arg8: memref<1x1x16xf32, #tpu.memory_space<vmem>>, %arg9: memref<1x32xf32, #tpu.memory_space<vmem>>, %arg10: memref<1x32xf32, #tpu.memory_space<vmem>>) attributes {dimension_semantics = [#tpu.dimension_semantics<arbitrary>], iteration_bounds = array<i64: 1>, scalar_prefetch = 1 : i64, scratch_operands = 1 : i64, tpu.core_type = #tpu.core_type<tc>, window_params = [{pipeline_mode = #tpu.pipeline_mode<synchronous>, transform_indices = @transform_0, window_bounds = array<i64: 1, 32>}, {pipeline_mode = #tpu.pipeline_mode<synchronous>, transform_indices = @transform_1, window_bounds = array<i64: 16, 96>}, {pipeline_mode = #tpu.pipeline_mode<synchronous>, transform_indices = @transform_2, window_bounds = array<i64: 32, 96>}, {pipeline_mode = #tpu.pipeline_mode<synchronous>, transform_indices = @transform_3, window_bounds = array<i64: 1, 96>}, {pipeline_mode = #tpu.pipeline_mode<synchronous>, transform_indices = @transform_4, window_bounds = array<i64: 32, 16>}, {pipeline_mode = #tpu.pipeline_mode<synchronous>, transform_indices = @transform_5, window_bounds = array<i64: 1, 16>}, {transform_indices = @transform_6, window_bounds = array<i64: 1, 1, 16>}, {pipeline_mode = #tpu.pipeline_mode<synchronous>, transform_indices = @transform_7, window_bounds = array<i64: 1, 32>}]} {
    %c0_i32 = arith.constant 0 : i32
    %0 = arith.cmpi eq, %arg0, %c0_i32 : i32
    %1 = arith.extui %0 : i1 to i32
    %c0_i32_0 = arith.constant 0 : i32
    %2 = arith.cmpi ne, %1, %c0_i32_0 : i32
    scf.if %2 {
      %c0_28 = arith.constant 0 : index
      %c0_29 = arith.constant 0 : index
      %66 = vector.load %arg2[%c0_28, %c0_29] : memref<1x32xf32, #tpu.memory_space<vmem>>, vector<1x32xf32>
      %c0_30 = arith.constant 0 : index
      %c0_31 = arith.constant 0 : index
      %67 = vector.load %arg10[%c0_30, %c0_31] : memref<1x32xf32, #tpu.memory_space<vmem>>, vector<1x32xf32>
      tpu.vector_store %arg10[%c0_30, %c0_31], %66 {strides = array<i32>} : memref<1x32xf32, #tpu.memory_space<vmem>>, vector<1x32xf32>,
    } else {
    }
    %c0 = arith.constant 0 : index
    %c0_1 = arith.constant 0 : index
    %3 = vector.load %arg10[%c0, %c0_1] : memref<1x32xf32, #tpu.memory_space<vmem>>, vector<1x32xf32>
    %4 = arith.index_cast %arg0 : i32 to index
    %5 = memref.load %arg1[%4] : memref<1xi32, #tpu.memory_space<smem>>
    %6 = tpu.iota {dimensions = array<i32: 1>} : vector<1x16xi32>
    %7 = vector.broadcast %5 : i32 to vector<1x16xi32>
    %8 = arith.cmpi eq, %6, %7 : vector<1x16xi32>
    %cst = arith.constant 1.000000e+00 : f32
    %cst_2 = arith.constant 0.000000e+00 : f32
    %9 = vector.broadcast %cst : f32 to vector<1x16xf32>
    %10 = vector.broadcast %cst_2 : f32 to vector<1x16xf32>
    %11 = arith.select %8, %9, %10 : vector<1x16xi1>, vector<1x16xf32>
    %c0_3 = arith.constant 0 : index
    %c0_4 = arith.constant 0 : index
    %12 = vector.load %arg3[%c0_3, %c0_4] : memref<16x96xf32, #tpu.memory_space<vmem>>, vector<16x96xf32>
    %cst_5 = arith.constant dense<0.000000e+00> : vector<1x96xf32>
    %13 = tpu.matmul %11, %12, %cst_5 {dimension_numbers = #tpu.dot_dimension_numbers<[1], [0], [0], [1], [0, 0, 1, 1], [], []>} : vector<1x16xf32>, vector<16x96xf32>, vector<1x96xf32> -> vector<1x96xf32>
    %c0_6 = arith.constant 0 : index
    %c0_7 = arith.constant 0 : index
    %14 = vector.load %arg4[%c0_6, %c0_7] : memref<32x96xf32, #tpu.memory_space<vmem>>, vector<32x96xf32>
    %cst_8 = arith.constant dense<0.000000e+00> : vector<1x96xf32>
    %15 = tpu.matmul %3, %14, %cst_8 {dimension_numbers = #tpu.dot_dimension_numbers<[1], [0], [0], [1], [0, 0, 1, 1], [], []>} : vector<1x32xf32>, vector<32x96xf32>, vector<1x96xf32> -> vector<1x96xf32>
    %c0_9 = arith.constant 0 : index
    %c0_10 = arith.constant 0 : index
    %16 = vector.load %arg5[%c0_9, %c0_10] : memref<1x96xf32, #tpu.memory_space<vmem>>, vector<1x96xf32>
    %17 = arith.addf %15, %16 : vector<1x96xf32>
    %18 = vector.extract_strided_slice %13 {offsets = [0, 0], sizes = [1, 32], strides = [1, 1]} : vector<1x96xf32> to vector<1x32xf32>
    %19 = vector.extract_strided_slice %17 {offsets = [0, 0], sizes = [1, 32], strides = [1, 1]} : vector<1x96xf32> to vector<1x32xf32>
    %20 = arith.addf %18, %19 : vector<1x32xf32>
    %21 = arith.negf %20 : vector<1x32xf32>
    %22 = math.exp %21 : vector<1x32xf32>
    %cst_11 = arith.constant 1.000000e+00 : f32
    %23 = vector.broadcast %cst_11 : f32 to vector<1x32xf32>
    %24 = arith.addf %23, %22 : vector<1x32xf32>
    %25 = arith.divf %23, %24 : vector<1x32xf32>
    %26 = vector.extract_strided_slice %13 {offsets = [0, 32], sizes = [1, 32], strides = [1, 1]} : vector<1x96xf32> to vector<1x32xf32>
    %27 = vector.extract_strided_slice %17 {offsets = [0, 32], sizes = [1, 32], strides = [1, 1]} : vector<1x96xf32> to vector<1x32xf32>
    %28 = arith.addf %26, %27 : vector<1x32xf32>
    %29 = arith.negf %28 : vector<1x32xf32>
    %30 = math.exp %29 : vector<1x32xf32>
    %cst_12 = arith.constant 1.000000e+00 : f32
    %31 = vector.broadcast %cst_12 : f32 to vector<1x32xf32>
    %32 = arith.addf %31, %30 : vector<1x32xf32>
    %33 = arith.divf %31, %32 : vector<1x32xf32>
    %34 = vector.extract_strided_slice %13 {offsets = [0, 64], sizes = [1, 32], strides = [1, 1]} : vector<1x96xf32> to vector<1x32xf32>
    %35 = vector.extract_strided_slice %17 {offsets = [0, 64], sizes = [1, 32], strides = [1, 1]} : vector<1x96xf32> to vector<1x32xf32>
    %36 = arith.mulf %25, %35 : vector<1x32xf32>
    %37 = arith.addf %34, %36 : vector<1x32xf32>
    %38 = math.tanh %37 : vector<1x32xf32>
    %cst_13 = arith.constant 1.000000e+00 : f32
    %39 = vector.broadcast %cst_13 : f32 to vector<1x32xf32>
    %40 = arith.subf %39, %33 : vector<1x32xf32>
    %41 = arith.mulf %40, %38 : vector<1x32xf32>
    %42 = arith.mulf %33, %3 : vector<1x32xf32>
    %43 = arith.addf %41, %42 : vector<1x32xf32>
    %c0_14 = arith.constant 0 : index
    %c0_15 = arith.constant 0 : index
    %44 = vector.load %arg10[%c0_14, %c0_15] : memref<1x32xf32, #tpu.memory_space<vmem>>, vector<1x32xf32>
    tpu.vector_store %arg10[%c0_14, %c0_15], %43 {strides = array<i32>} : memref<1x32xf32, #tpu.memory_space<vmem>>, vector<1x32xf32>,
    %c0_16 = arith.constant 0 : index
    %c0_17 = arith.constant 0 : index
    %45 = vector.load %arg6[%c0_16, %c0_17] : memref<32x16xf32, #tpu.memory_space<vmem>>, vector<32x16xf32>
    %cst_18 = arith.constant dense<0.000000e+00> : vector<1x16xf32>
    %46 = tpu.matmul %43, %45, %cst_18 {dimension_numbers = #tpu.dot_dimension_numbers<[1], [0], [0], [1], [0, 0, 1, 1], [], []>} : vector<1x32xf32>, vector<32x16xf32>, vector<1x16xf32> -> vector<1x16xf32>
    %c0_19 = arith.constant 0 : index
    %c0_20 = arith.constant 0 : index
    %47 = vector.load %arg7[%c0_19, %c0_20] : memref<1x16xf32, #tpu.memory_space<vmem>>, vector<1x16xf32>
    %48 = arith.addf %46, %47 : vector<1x16xf32>
    %cst_21 = arith.constant dense<0xFF800000> : vector<1xf32>
    %49 = vector.multi_reduction <maximumf>, %48, %cst_21 [1] : vector<1x16xf32> to vector<1xf32>
    %50 = vector.shape_cast %49 : vector<1xf32> to vector<1x1xf32>
    %51 = vector.broadcast %50 : vector<1x1xf32> to vector<1x16xf32>
    %52 = arith.subf %48, %51 : vector<1x16xf32>
    %53 = math.exp %52 : vector<1x16xf32>
    %cst_22 = arith.constant dense<0.000000e+00> : vector<1xf32>
    %54 = vector.multi_reduction <add>, %53, %cst_22 [1] : vector<1x16xf32> to vector<1xf32>
    %55 = vector.shape_cast %54 : vector<1xf32> to vector<1x1xf32>
    %56 = math.log %55 : vector<1x1xf32>
    %57 = vector.broadcast %50 : vector<1x1xf32> to vector<1x16xf32>
    %58 = arith.subf %48, %57 : vector<1x16xf32>
    %59 = vector.broadcast %56 : vector<1x1xf32> to vector<1x16xf32>
    %60 = arith.subf %58, %59 : vector<1x16xf32>
    %61 = vector.shape_cast %60 : vector<1x16xf32> to vector<1x1x16xf32>
    %c0_23 = arith.constant 0 : index
    %c0_24 = arith.constant 0 : index
    %c0_25 = arith.constant 0 : index
    %62 = vector.load %arg8[%c0_23, %c0_24, %c0_25] : memref<1x1x16xf32, #tpu.memory_space<vmem>>, vector<1x1x16xf32>
    tpu.vector_store %arg8[%c0_23, %c0_24, %c0_25], %61 {strides = array<i32>} : memref<1x1x16xf32, #tpu.memory_space<vmem>>, vector<1x1x16xf32>,
    %c0_i32_26 = arith.constant 0 : i32
    %63 = arith.cmpi eq, %arg0, %c0_i32_26 : i32
    %64 = arith.extui %63 : i1 to i32
    %c0_i32_27 = arith.constant 0 : i32
    %65 = arith.cmpi ne, %64, %c0_i32_27 : i32
    scf.if %65 {
      %c0_28 = arith.constant 0 : index
      %c0_29 = arith.constant 0 : index
      %66 = vector.load %arg9[%c0_28, %c0_29] : memref<1x32xf32, #tpu.memory_space<vmem>>, vector<1x32xf32>
      tpu.vector_store %arg9[%c0_28, %c0_29], %43 {strides = array<i32>} : memref<1x32xf32, #tpu.memory_space<vmem>>, vector<1x32xf32>,
    } else {
    }
    return
  }
  func.func @transform_0(%arg0: i32, %arg1: memref<1xi32, #tpu.memory_space<smem>>) -> (i32, i32) {
    %c0_i32 = arith.constant 0 : i32
    %c0_i32_0 = arith.constant 0 : i32
    %c0_i32_1 = arith.constant 0 : i32
    return %c0_i32, %c0_i32_0 : i32, i32
  }
  func.func @transform_1(%arg0: i32, %arg1: memref<1xi32, #tpu.memory_space<smem>>) -> (i32, i32) {
    %c0_i32 = arith.constant 0 : i32
    %c0_i32_0 = arith.constant 0 : i32
    %c0_i32_1 = arith.constant 0 : i32
    return %c0_i32, %c0_i32_0 : i32, i32
  }
  func.func @transform_2(%arg0: i32, %arg1: memref<1xi32, #tpu.memory_space<smem>>) -> (i32, i32) {
    %c0_i32 = arith.constant 0 : i32
    %c0_i32_0 = arith.constant 0 : i32
    %c0_i32_1 = arith.constant 0 : i32
    return %c0_i32, %c0_i32_0 : i32, i32
  }
  func.func @transform_3(%arg0: i32, %arg1: memref<1xi32, #tpu.memory_space<smem>>) -> (i32, i32) {
    %c0_i32 = arith.constant 0 : i32
    %c0_i32_0 = arith.constant 0 : i32
    %c0_i32_1 = arith.constant 0 : i32
    return %c0_i32, %c0_i32_0 : i32, i32
  }
  func.func @transform_4(%arg0: i32, %arg1: memref<1xi32, #tpu.memory_space<smem>>) -> (i32, i32) {
    %c0_i32 = arith.constant 0 : i32
    %c0_i32_0 = arith.constant 0 : i32
    %c0_i32_1 = arith.constant 0 : i32
    return %c0_i32, %c0_i32_0 : i32, i32
  }
  func.func @transform_5(%arg0: i32, %arg1: memref<1xi32, #tpu.memory_space<smem>>) -> (i32, i32) {
    %c0_i32 = arith.constant 0 : i32
    %c0_i32_0 = arith.constant 0 : i32
    %c0_i32_1 = arith.constant 0 : i32
    return %c0_i32, %c0_i32_0 : i32, i32
  }
  func.func @transform_6(%arg0: i32, %arg1: memref<1xi32, #tpu.memory_space<smem>>) -> (i32, i32, i32) {
    %c0_i32 = arith.constant 0 : i32
    %c0_i32_0 = arith.constant 0 : i32
    %c0_i32_1 = arith.constant 0 : i32
    return %arg0, %c0_i32, %c0_i32_0 : i32, i32, i32
  }
  func.func @transform_7(%arg0: i32, %arg1: memref<1xi32, #tpu.memory_space<smem>>) -> (i32, i32) {
    %c0_i32 = arith.constant 0 : i32
    %c0_i32_0 = arith.constant 0 : i32
    %c0_i32_1 = arith.constant 0 : i32
    return %c0_i32, %c0_i32_0 : i32, i32
  }
}

</mosaic_0001>

<bundles_post_ra>
// kernel: tpu_custom_call.1
= control target key start
LH: loop header
LB: loop body
LE: loop exit
PB: predicated region body
PF: predicated region fallthrough
CT: control target
= control target key end

     0   :  { %15 = vsyncpa [#allocation6], 0  ;;  %v38_v3 = vlaneseq  ;;  %v487_v4 = vmov 0.0|0.0   ;;  %vm34_vm0 = vcmask 253952   ;;  %vm488_vm1 = vmmov 0   ;;  %s617_s0 = inlined_call_operand.<no memory space> [shape: s32[1], index: 0, kind: input, shape index: {}]   ;;  %s618_s1 = inlined_call_operand.vmem [shape: f32[1,32], index: 1, kind: input, shape index: {}]   ;;  %s619_s2 = inlined_call_operand.vmem [shape: f32[16,96], index: 2, kind: input, shape index: {}]   ;;  %s620_s3 = inlined_call_operand.vmem [shape: f32[32,96], index: 3, kind: input, shape index: {}]   ;;  %s621_s4 = inlined_call_operand.vmem [shape: f32[1,96], index: 4, kind: input, shape index: {}]   ;;  %s622_s5 = inlined_call_operand.vmem [shape: f32[32,16], index: 5, kind: input, shape index: {}]   ;;  %s623_s6 = inlined_call_operand.vmem [shape: f32[1,16], index: 6, kind: input, shape index: {}]   ;;  %s624_s7 = inlined_call_operand.hbm [shape: f32[1,1,16], index: 7, kind: output, shape index: {0}]   ;;  %s625_s8 = inlined_call_operand.hbm [shape: f32[1,32], index: 8, kind: output, shape index: {1}]  }
   0x1   :  { %v119_v0 = vld [vmem:[%s620_s3] sm:$0xff]  ;;  %v120_v1 = vld [vmem:[%s620_s3 + $0x8] sm:$0xff]  ;;  %v121_v2 = vld [vmem:[%s620_s3 + $0x10] sm:$0xff]  ;;  %409 = vmatprep.subr.bf16.mxu1 %v487_v4  ;;  %406 = vmatprep.subr.bf16.mxu0 %v487_v4  ;;  %v40_v9 = vstv %s617_s0  ;;  %v489_v11 = vmov 0.0  }
   0x2   :  { %v410_v5 = vpack.c.bf16 %v120_v1, %v119_v0  ;;  %v122_v6 = vld [vmem:[%s620_s3 + $0x18] sm:$0xff]  ;;  %v43_v7 = vld [vmem:[%s619_s2] sm:$0xff]  ;;  %v44_v8 = vld [vmem:[%s619_s2 + $0x8] sm:$0xff]  ;;  %392 = vmatprep.mubr.msk.f32.mxu1 %vm488_vm1, %v489_v11  ;;  %381 = vmatprep.mubr.msk.f32.mxu0 %vm488_vm1, %v489_v11  ;;  %v39_v13 = vand.u32 127, %v38_v3 }
   0x3   :  { %v407_v10 = vpack.c.bf16 %v44_v8, %v43_v7  ;;  %v33_v12 = vld [vmem:[%s618_s1] sm:$0x1]  ;;  %v413_v14 = vpack.c.bf16 %v122_v6, %v121_v2 }
   0x4   :  { %411 = vmatpush3.bf16.msra.mxu1 %v410_v5  ;;  %35 = vst.msk [vmem:[#allocation2] sm:$0x1] %vm34_vm0, %v33_v12 }
   0x5   :  { %16 = vsyncpa [#allocation8], 0  ;;  %412 = vmatprep.subr.bf16.mxu1 %v487_v4  ;;  %408 = vmatpush3.bf16.msra.mxu0 %v407_v10  ;;  %vm41_vm2 = vcmp.eq.s32.totalorder %v39_v13, %v40_v9  ;;  %vm45_vm3 = vcmask 130048   ;;  %vm124_vm4 = vcmask 261120   ;;  %v123_v19 = vld [vmem:[%s621_s4] sm:$0x1] }
   0x6   :  { %v42_v15 = vsel %vm41_vm2, 1.0, %v489_v11  ;;  %415 = vmatprep.subr.bf16.mxu0 %v487_v4  ;;  %s490_s2 = smov 64   ;;  %v223_v32 = vshrl.u32 %v38_v3, 7  ;;  %v237_v33 = vld [vmem:[%s622_s5] sm:$0xff]  ;;  %v238_v34 = vld [vmem:[%s622_s5 + $0x8] sm:$0xff]  ;;  %v239_v35 = vld [vmem:[%s622_s5 + $0x10] sm:$0xff] }
   0x7   :  { %v416_v37 = vpack.c.bf16 %v238_v34, %v237_v33  ;;  %v240_v38 = vld [vmem:[%s622_s5 + $0x18] sm:$0xff]  ;;  %s491_s27 = smov 96   ;;  %s492_s28 = smov 32   ;;  %v241_v49 = vld [vmem:[%s623_s6] sm:$0x1]  ;;  %vm314_vm5 = vcmask 122880  }
   0x8   :  { %414 = vmatpush3.bf16.msra.mxu1 %v413_v14  ;;  %382 = vmatmul.mubr.msk.f32.vlgmr.msra.gmra.mrb[0].mxu0 %vm45_vm3, %v42_v15  ;;  %v224_v36 = vsub.s32 0, %v223_v32  ;;  %v419_v39 = vpack.c.bf16 %v240_v38, %v239_v35  ;;  %s493_s30 = smov [#allocation7]  }
   0x9   :  { %403 = vmatprep.mubr.msk.f32.mxu0 %vm488_vm1, %v489_v11  ;;  %417 = vmatpush3.bf16.msra.mxu0 %v416_v37  ;;  %s348_s9 = sshll.u32 %s493_s30, 4  ;;  %s349_s9 = int_to_ptr.vmem [resolvable:$true] %s348_s9 }
   0xa   :  { %418 = vmatprep.subr.bf16.mxu0 %v487_v4  ;;  %s439_s10 = scalar_lea.vmem %s349_s9, 16  ;;  %s443_s6 = scalar_lea.vmem %s349_s9, 32 }
   0xb   :  { %v36_v16 = vld [vmem:[#allocation2] sm:$0x1]  ;;  %p440_p0 = scmp.ne.s32.totalorder %s349_s9, %s439_s10  ;;  %p444_p1 = scmp.lt.s32.totalorder %s349_s9, %s349_s9 }
   0xc   :  { %393 = vmatmul.mubr.msk.f32.vlgmr.msra.gmra.mrb[0].mxu1 %vm124_vm4, %v36_v16  ;;  %v225_v41 = vrot.slane %v36_v16, %v224_v36  ;;  %p445_p2 = scmp.lt.s32.totalorder %s443_s6, %s439_s10 }
   0xd   :  { %420 = vmatpush3.bf16.msra.mxu0 %v419_v39 }
   0xe   :  { %p446_p3 = por %p445_p2, %p444_p1 }
  0x10   :  { %p447_p4 = pnand %p446_p3, %p440_p0 }
  0xdb   :  { %v115_v17 = vpop.f32.mrb[0].mxu0 }
  0xdc   :  { %v383_v18 = vpop.f32.mrb[1].mxu0 }
  0xdf   :  { %v194_v20 = vpop.f32.mrb[0].mxu1 }
  0xe0   :  { %v195_v21 = vadd.f32 %v194_v20, %v123_v19  ;;  %v394_v22 = vpop.f32.mrb[1].mxu1 }
  0xe2   :  { %v198_v23 = vadd.f32 %v195_v21, %v115_v17  ;;  %206 = vrot.lane.b32.xlu0 %v195_v21, %s490_s2 }
  0xe4   :  { %v362_v24 = vmul.f32 -1.442695, %v198_v23 }
  0xe6   :  { %429 = vpow2.f32 %v362_v24 }
  0xf0   :  { %v430_v25 = vpop.eup %429 }
  0xf1   :  { %v202_v26 = vadd.f32 1.0, %v430_v25 }
  0xf3   :  { %431 = vrcp.f32 %v202_v26 }
  0xfd   :  { %v432_v27 = vpop.eup %431 }
  0xfe   :  { %v216_v43 = vsub.f32 1.0, %v432_v27 }
 0x154   :  { %v207_v28 = vpop.permute.xlu0 %206 }
 0x155   :  { %v209_v29 = vmul.f32 %v432_v27, %v207_v28 }
 0x157   :  { %211 = vrot.lane.b32.xlu0 %v209_v29, %s490_s2 }
 0x1c9   :  { %v212_v30 = vpop.permute.xlu0 %211 }
 0x1ca   :  { %v214_v31 = vadd.f32 %v212_v30, %v115_v17 }
 0x1cc   :  { %433 = vtanh.f32 %v214_v31 }
 0x1d6   :  { %v434_v40 = vpop.eup %433 }
 0x1d7   :  { %218 = vrot.lane.b32.xlu1 %v434_v40, %s491_s27 }
 0x1db   :  { %226 = vrot.lane.b32.xlu1 %v225_v41, %s492_s28 }
 0x249   :  { %v219_v42 = vpop.permute.xlu1 %218 }
 0x24a   :  { %v221_v45 = vmul.f32 %v219_v42, %v216_v43 }
 0x24d   :  { %v227_v44 = vpop.permute.xlu1 %226 }
 0x24e   :  { %v229_v46 = vmul.f32 %v432_v27, %v227_v44 }
 0x250   :  { %v230_v47 = vadd.f32 %v229_v46, %v221_v45 }
 0x252   :  { %232 = vrot.lane.b32.xlu0 %v230_v47, %s491_s27 }
 0x2c4   :  { %v233_v48 = vpop.permute.xlu0 %232 }
 0x2c5   :  { %236 = vst.msk [vmem:[#allocation2] sm:$0x1] %vm34_vm0, %v233_v48  ;;  %331 = vst.msk [vmem:[#allocation7] sm:$0x1] %vm34_vm0, %v233_v48  ;;  %404 = vmatmul.mubr.msk.f32.vlgmr.msra.gmra.mrb[2].mxu0 %vm124_vm4, %v233_v48 }
 0x398   :  { %v310_v50 = vpop.f32.mrb[2].mxu0 }
 0x399   :  { %v311_v51 = vadd.f32 %v310_v50, %v241_v49  ;;  %v405_v52 = vpop.f32.mrb[3].mxu0 }
 0x39b   :  { %v315_v53 = vsel %vm314_vm5, %v311_v51, -inf }
 0x39c   :  { %316 = vmax.xlane.f32.xlu1 %v315_v53 }
 0x429   :  { %v317_v54 = vpop.xlane.xlu1 %316 }
 0x42a   :  { %v318_v55 = vsub.f32 %v311_v51, %v317_v54 }
 0x42c   :  { %v319_v56 = vmul.f32 1.442695, %v318_v55 }
 0x42e   :  { %435 = vpow2.f32 %v319_v56 }
 0x438   :  { %v436_v57 = vpop.eup %435 }
 0x439   :  { %v321_v58 = vsel %vm314_vm5, %v436_v57, 0.0 }
 0x43a   :  { %322 = vadd.xlane.f32.xlu0 %v321_v58 }
 0x43b   :  { %450 = shalt.err (!%p447_p4)
}
 0x43c   :  { %s451_s13 = scalar_lea.hbm %s625_s8, 16 }
 0x43d   :  { %p452_p5 = scmp.ne.s32.totalorder %s625_s8, %s451_s13  ;;  %p455_p6 = scmp.lt.u32.totalorder %s451_s13, %s625_s8 }
 0x43f   :  { %p457_p7 = pnand %p455_p6, %p452_p5 }
 0x441   :  { %460 = shalt.err (!%p457_p7)
}
 0x442   :  { %351 = dma.vmem_to_hbm [thread:$0]  %s349_s9, 16, %s625_s8, [#allocation8]  }
 0x443   :  { %s494_s19 = smov [#allocation5]  }
 0x444   :  { %s338_s0 = sshll.u32 %s494_s19, 4  ;;  %s339_s0 = int_to_ptr.vmem [resolvable:$true] %s338_s0 }
 0x445   :  { %s461_s1 = scalar_lea.vmem %s339_s0, 16  ;;  %s465_s2 = scalar_lea.vmem %s339_s0, 32 }
 0x446   :  { %p462_p8 = scmp.ne.s32.totalorder %s339_s0, %s461_s1  ;;  %p466_p9 = scmp.lt.s32.totalorder %s339_s0, %s339_s0 }
 0x447   :  { %p467_p10 = scmp.lt.s32.totalorder %s465_s2, %s461_s1 }
 0x449   :  { %p468_p11 = por %p467_p10, %p466_p9 }
 0x44b   :  { %p469_p12 = pnand %p468_p11, %p462_p8 }
 0x4c7   :  { %v323_v59 = vpop.xlane.xlu0 %322 }
 0x4c8   :  { %437 = vlog2.f32 %v323_v59 }
 0x4d2   :  { %v438_v60 = vpop.eup %437 }
 0x4d3   :  { %v325_v61 = vmul.f32 0.6931472, %v438_v60 }
 0x4d5   :  { %v326_v62 = vsub.f32 %v318_v55, %v325_v61 }
 0x4d7   :  { %327 = vst.msk [vmem:[#allocation5] sm:$0x1] %vm314_vm5, %v326_v62 }
 0x4d8   :  { %472 = shalt.err (!%p469_p12)
}
 0x4d9   :  { %s473_s20 = scalar_lea.hbm %s624_s7, 16 }
 0x4da   :  { %p474_p13 = scmp.ne.s32.totalorder %s624_s7, %s473_s20  ;;  %p477_p0 = scmp.lt.u32.totalorder %s473_s20, %s624_s7 }
 0x4dc   :  { %p479_p1 = pnand %p477_p0, %p474_p13 }
 0x4de   :  { %482 = shalt.err (!%p479_p1)
}
 0x4df   :  { %341 = dma.vmem_to_hbm [thread:$0]  %s339_s0, 16, %s624_s7, [#allocation6]  }
 0x4e0   :  { %483 = dma.done.wait [#allocation6], 16  }
 0x4e1   :  { %484 = vsyncadd [#allocation6], 4294967280 }
 0x4e2   :  { %485 = dma.done.wait [#allocation8], 16  }
 0x4e3   :  { %486 = vsyncadd [#allocation8], 4294967280 }
 0x4e4   :  { %358 = vsyncpa [#allocation6], 1 }
 0x4e5   :  { %359 = vsyncpa [#allocation8], 1 }

</bundles_post_ra>
